<compile_context>
chip_gen: v7x
topology: tpu7x:2x2x1
jax: 0.10.0
libtpu: 0.0.40
codegen_flags: <defaults>
</compile_context>

<pallas_src>
import functools

import jax
import jax.numpy as jnp
from jax.experimental import pallas as pl
from jax.experimental.pallas import tpu as pltpu


def _round_up(x, m):
    return ((x + m - 1) // m) * m


def mlp_kernel(x_ref, w1_ref, b1_ref, w2_ref, b2_ref, w3_ref, b3_ref, o_ref):
    """Fused 3-layer MLP on one batch tile.

    x/w are bf16 (MXU-native), accumulation is f32, bias add + ReLU are f32
    (v5e has no bf16 VALU); intermediates are re-cast to bf16 to feed the MXU.
    """
    x = x_ref[...]
    h1 = jnp.dot(x, w1_ref[...], preferred_element_type=jnp.float32) + b1_ref[...]
    h1 = jnp.maximum(h1, 0.0).astype(jnp.bfloat16)
    h2 = jnp.dot(h1, w2_ref[...], preferred_element_type=jnp.float32) + b2_ref[...]
    h2 = jnp.maximum(h2, 0.0).astype(jnp.bfloat16)
    out = jnp.dot(h2, w3_ref[...], preferred_element_type=jnp.float32) + b3_ref[...]
    o_ref[...] = out.astype(o_ref.dtype)


def _vmem_budget_bytes(block_b, d_in, h, c):
    """Rough VMEM bytes needed for one pipelined step at tile `block_b`."""
    bf16, f32 = 2, 4
    x_bytes = 2 * block_b * d_in * bf16                      # double-buffered x tile
    out_bytes = 2 * block_b * c * f32                        # double-buffered out tile
    w_bytes = 2 * ((d_in * h + h * h + h * c) * bf16         # resident weights
                   + (h + h + c) * f32)                      # resident biases
    act_bytes = 2 * block_b * h * (f32 + bf16)               # h1/h2 f32 + bf16 copies
    margin = 4 * 1024 * 1024                                 # compiler scratch headroom
    return x_bytes + out_bytes + w_bytes + act_bytes + margin


def _pick_block_b(batch, d_in, h, c):
    """Largest batch tile (multiple of 8) whose working set fits the VMEM budget."""
    try:
        vmem_phys = pltpu.get_tpu_info().vmem_capacity_bytes
    except Exception:  # be conservative if the query is unavailable
        vmem_phys = 64 * 1024 * 1024                         # v7x per-TC VMEM
    target = int(vmem_phys * 0.6)                            # leave headroom
    for cand in (4096, 2048, 1024, 512, 256, 128, 64, 32, 16, 8):
        if _vmem_budget_bytes(cand, d_in, h, c) <= target:
            block_b = cand
            break
    else:
        block_b = 8
    # Never exceed the (sublane-padded) batch itself.
    return min(block_b, _round_up(max(batch, 1), 8))


@functools.partial(jax.jit, static_argnames=("block_b",))
def neural_net_forward(x, params, *, block_b=None):
    """x: (B, input_size) f32. params: dict of w1,b1,w2,b2,w3,b3 (f32)."""
    B, D_in = x.shape
    H = params["w1"].shape[1]
    C = params["w3"].shape[1]

    if block_b is None:
        block_b = _pick_block_b(B, D_in, H, C)
    block_b = _round_up(max(int(block_b), 8), 8)             # f32 sublane alignment

    # Pad the batch so every grid step sees a full tile (padded rows are zeros
    # and get sliced off at the end) -> no silently dropped remainder rows.
    B_pad = _round_up(B, block_b)
    if B_pad != B:
        x = jnp.pad(x, ((0, B_pad - B), (0, 0)))
    grid = (pl.cdiv(B_pad, block_b),)

    # bf16 operands for the MXU / halved HBM traffic; biases stay f32.
    x_bf = x.astype(jnp.bfloat16)
    w1 = params["w1"].astype(jnp.bfloat16)
    w2 = params["w2"].astype(jnp.bfloat16)
    w3 = params["w3"].astype(jnp.bfloat16)
    b1, b2, b3 = params["b1"], params["b2"], params["b3"]

    def resident(shape):
        # Constant index_map -> the whole (small) weight/bias stays in VMEM
        # across all grid steps; only x/out are streamed.
        return pl.BlockSpec(shape, lambda i: (0,) * len(shape))

    flops = 2 * B_pad * (D_in * H + H * H + H * C)
    bytes_accessed = (B_pad * D_in * 2 + B_pad * C * 4
                      + (D_in * H + H * H + H * C) * 2 + (H + H + C) * 4)
    cost = pl.CostEstimate(flops=flops, transcendentals=0,
                           bytes_accessed=bytes_accessed)

    vmem_limit = min(max(_vmem_budget_bytes(block_b, D_in, H, C),
                         32 * 1024 * 1024),
                     64 * 1024 * 1024)

    out = pl.pallas_call(
        mlp_kernel,
        out_shape=jax.ShapeDtypeStruct((B_pad, C), jnp.float32),
        grid_spec=pltpu.PrefetchScalarGridSpec(
            num_scalar_prefetch=0,
            grid=grid,
            in_specs=[
                pl.BlockSpec((block_b, D_in), lambda i: (i, 0)),  # x, streamed on batch
                resident((D_in, H)),   # w1
                resident((1, H)),      # b1
                resident((H, H)),      # w2
                resident((1, H)),      # b2
                resident((H, C)),      # w3
                resident((1, C)),      # b3
            ],
            out_specs=pl.BlockSpec((block_b, C), lambda i: (i, 0)),
        ),
        compiler_params=pltpu.CompilerParams(
            dimension_semantics=("parallel",),     # shard batch tiles across TCs (v7x)
            vmem_limit_bytes=int(vmem_limit),
        ),
        cost_estimate=cost,
    )(x_bf, w1, b1, w2, b2, w3, b3)

    return out[:B]


def init_params(key, input_size, hidden_size, num_classes):
    """Deterministic init (Kaiming-uniform-ish like torch defaults, but synthetic)."""
    ks = jax.random.split(key, 6)

    def lin(kw, kb, fan_in, fan_out):
        bound = 1.0 / jnp.sqrt(fan_in)
        w = jax.random.uniform(kw, (fan_in, fan_out), jnp.float32, -bound, bound)
        b = jax.random.uniform(kb, (1, fan_out), jnp.float32, -bound, bound)
        return w, b

    w1, b1 = lin(ks[0], ks[1], input_size, hidden_size)
    w2, b2 = lin(ks[2], ks[3], hidden_size, hidden_size)
    w3, b3 = lin(ks[4], ks[5], hidden_size, num_classes)
    return {"w1": w1, "b1": b1, "w2": w2, "b2": b2, "w3": w3, "b3": b3}


if __name__ == "__main__":
    # Small shapes consistent with the module. C=32 (<128) keeps stores masked
    # and B=8 underfills the MXU rows -- at this toy size the kernel is launch/
    # DMA-overhead dominated; the tiling/bf16 changes target realistic batches.
    input_size, hidden_size, num_classes = 64, 128, 32
    batch = 8

    key = jax.random.PRNGKey(0)
    kx, kp = jax.random.split(key)
    x = jax.random.normal(kx, (batch, input_size), dtype=jnp.float32)
    params = init_params(kp, input_size, hidden_size, num_classes)

    out = neural_net_forward(x, params)
    out = jax.block_until_ready(out)
    assert out.shape == (batch, num_classes)

    # Reference 1: same numerics as the kernel (bf16 operands, f32 accumulate).
    xb = x.astype(jnp.bfloat16)
    w1b = params["w1"].astype(jnp.bfloat16)
    w2b = params["w2"].astype(jnp.bfloat16)
    w3b = params["w3"].astype(jnp.bfloat16)
    h1 = jnp.maximum(
        jnp.dot(xb, w1b, preferred_element_type=jnp.float32) + params["b1"], 0.0
    ).astype(jnp.bfloat16)
    h2 = jnp.maximum(
        jnp.dot(h1, w2b, preferred_element_type=jnp.float32) + params["b2"], 0.0
    ).astype(jnp.bfloat16)
    ref_bf16 = jnp.dot(h2, w3b, preferred_element_type=jnp.float32) + params["b3"]
    assert jnp.allclose(out, ref_bf16, atol=2e-2, rtol=2e-2)

    # Reference 2: pure-f32 PyTorch semantics, looser tolerance (bf16 operands).
    h1f = jnp.maximum(x @ params["w1"] + params["b1"], 0.0)
    h2f = jnp.maximum(h1f @ params["w2"] + params["b2"], 0.0)
    ref_f32 = h2f @ params["w3"] + params["b3"]
    assert jnp.allclose(out, ref_f32, atol=5e-2, rtol=5e-2)

    print("KERNEL_OK")
</pallas_src>

<mosaic_0001>
module attributes {stable_mosaic.version = 11 : i64} {
  func.func @mlp_kernel(%arg0: i32, %arg1: memref<8x64xbf16, #tpu.memory_space<vmem>>, %arg2: memref<64x128xbf16, #tpu.memory_space<vmem>>, %arg3: memref<1x128xf32, #tpu.memory_space<vmem>>, %arg4: memref<128x128xbf16, #tpu.memory_space<vmem>>, %arg5: memref<1x128xf32, #tpu.memory_space<vmem>>, %arg6: memref<128x32xbf16, #tpu.memory_space<vmem>>, %arg7: memref<1x32xf32, #tpu.memory_space<vmem>>, %arg8: memref<8x32xf32, #tpu.memory_space<vmem>>) attributes {dimension_semantics = [#tpu.dimension_semantics<parallel>], iteration_bounds = array<i64: 1>, scalar_prefetch = 0 : i64, scratch_operands = 0 : i64, tpu.core_type = #tpu.core_type<tc>, window_params = [{transform_indices = @transform_0, window_bounds = array<i64: 8, 64>}, {pipeline_mode = #tpu.pipeline_mode<synchronous>, transform_indices = @transform_1, window_bounds = array<i64: 64, 128>}, {pipeline_mode = #tpu.pipeline_mode<synchronous>, transform_indices = @transform_2, window_bounds = array<i64: 1, 128>}, {pipeline_mode = #tpu.pipeline_mode<synchronous>, transform_indices = @transform_3, window_bounds = array<i64: 128, 128>}, {pipeline_mode = #tpu.pipeline_mode<synchronous>, transform_indices = @transform_4, window_bounds = array<i64: 1, 128>}, {pipeline_mode = #tpu.pipeline_mode<synchronous>, transform_indices = @transform_5, window_bounds = array<i64: 128, 32>}, {pipeline_mode = #tpu.pipeline_mode<synchronous>, transform_indices = @transform_6, window_bounds = array<i64: 1, 32>}, {transform_indices = @transform_7, window_bounds = array<i64: 8, 32>}]} {
    %c0 = arith.constant 0 : index
    %c0_0 = arith.constant 0 : index
    %0 = vector.load %arg1[%c0, %c0_0] : memref<8x64xbf16, #tpu.memory_space<vmem>>, vector<8x64xbf16>
    %c0_1 = arith.constant 0 : index
    %c0_2 = arith.constant 0 : index
    %1 = vector.load %arg2[%c0_1, %c0_2] : memref<64x128xbf16, #tpu.memory_space<vmem>>, vector<64x128xbf16>
    %cst = arith.constant dense<0.000000e+00> : vector<8x128xf32>
    %2 = tpu.matmul %0, %1, %cst {dimension_numbers = #tpu.dot_dimension_numbers<[1], [0], [0], [1], [0, 0, 1, 1], [], []>} : vector<8x64xbf16>, vector<64x128xbf16>, vector<8x128xf32> -> vector<8x128xf32>
    %c0_3 = arith.constant 0 : index
    %c0_4 = arith.constant 0 : index
    %3 = vector.load %arg3[%c0_3, %c0_4] : memref<1x128xf32, #tpu.memory_space<vmem>>, vector<1x128xf32>
    %4 = vector.broadcast %3 : vector<1x128xf32> to vector<8x128xf32>
    %5 = arith.addf %2, %4 : vector<8x128xf32>
    %cst_5 = arith.constant 0.000000e+00 : f32
    %6 = vector.broadcast %cst_5 : f32 to vector<8x128xf32>
    %7 = arith.maximumf %5, %6 : vector<8x128xf32>
    %8 = arith.truncf %7 : vector<8x128xf32> to vector<8x128xbf16>
    %c0_6 = arith.constant 0 : index
    %c0_7 = arith.constant 0 : index
    %9 = vector.load %arg4[%c0_6, %c0_7] : memref<128x128xbf16, #tpu.memory_space<vmem>>, vector<128x128xbf16>
    %cst_8 = arith.constant dense<0.000000e+00> : vector<8x128xf32>
    %10 = tpu.matmul %8, %9, %cst_8 {dimension_numbers = #tpu.dot_dimension_numbers<[1], [0], [0], [1], [0, 0, 1, 1], [], []>} : vector<8x128xbf16>, vector<128x128xbf16>, vector<8x128xf32> -> vector<8x128xf32>
    %c0_9 = arith.constant 0 : index
    %c0_10 = arith.constant 0 : index
    %11 = vector.load %arg5[%c0_9, %c0_10] : memref<1x128xf32, #tpu.memory_space<vmem>>, vector<1x128xf32>
    %12 = vector.broadcast %11 : vector<1x128xf32> to vector<8x128xf32>
    %13 = arith.addf %10, %12 : vector<8x128xf32>
    %cst_11 = arith.constant 0.000000e+00 : f32
    %14 = vector.broadcast %cst_11 : f32 to vector<8x128xf32>
    %15 = arith.maximumf %13, %14 : vector<8x128xf32>
    %16 = arith.truncf %15 : vector<8x128xf32> to vector<8x128xbf16>
    %c0_12 = arith.constant 0 : index
    %c0_13 = arith.constant 0 : index
    %17 = vector.load %arg6[%c0_12, %c0_13] : memref<128x32xbf16, #tpu.memory_space<vmem>>, vector<128x32xbf16>
    %cst_14 = arith.constant dense<0.000000e+00> : vector<8x32xf32>
    %18 = tpu.matmul %16, %17, %cst_14 {dimension_numbers = #tpu.dot_dimension_numbers<[1], [0], [0], [1], [0, 0, 1, 1], [], []>} : vector<8x128xbf16>, vector<128x32xbf16>, vector<8x32xf32> -> vector<8x32xf32>
    %c0_15 = arith.constant 0 : index
    %c0_16 = arith.constant 0 : index
    %19 = vector.load %arg7[%c0_15, %c0_16] : memref<1x32xf32, #tpu.memory_space<vmem>>, vector<1x32xf32>
    %20 = vector.broadcast %19 : vector<1x32xf32> to vector<8x32xf32>
    %21 = arith.addf %18, %20 : vector<8x32xf32>
    %c0_17 = arith.constant 0 : index
    %c0_18 = arith.constant 0 : index
    %22 = vector.load %arg8[%c0_17, %c0_18] : memref<8x32xf32, #tpu.memory_space<vmem>>, vector<8x32xf32>
    tpu.vector_store %arg8[%c0_17, %c0_18], %21 {strides = array<i32>} : memref<8x32xf32, #tpu.memory_space<vmem>>, vector<8x32xf32>,
    return
  }
  func.func @transform_0(%arg0: i32) -> (i32, i32) {
    %c0_i32 = arith.constant 0 : i32
    %c0_i32_0 = arith.constant 0 : i32
    return %arg0, %c0_i32 : i32, i32
  }
  func.func @transform_1(%arg0: i32) -> (i32, i32) {
    %c0_i32 = arith.constant 0 : i32
    %c0_i32_0 = arith.constant 0 : i32
    %c0_i32_1 = arith.constant 0 : i32
    return %c0_i32, %c0_i32_0 : i32, i32
  }
  func.func @transform_2(%arg0: i32) -> (i32, i32) {
    %c0_i32 = arith.constant 0 : i32
    %c0_i32_0 = arith.constant 0 : i32
    %c0_i32_1 = arith.constant 0 : i32
    return %c0_i32, %c0_i32_0 : i32, i32
  }
  func.func @transform_3(%arg0: i32) -> (i32, i32) {
    %c0_i32 = arith.constant 0 : i32
    %c0_i32_0 = arith.constant 0 : i32
    %c0_i32_1 = arith.constant 0 : i32
    return %c0_i32, %c0_i32_0 : i32, i32
  }
  func.func @transform_4(%arg0: i32) -> (i32, i32) {
    %c0_i32 = arith.constant 0 : i32
    %c0_i32_0 = arith.constant 0 : i32
    %c0_i32_1 = arith.constant 0 : i32
    return %c0_i32, %c0_i32_0 : i32, i32
  }
  func.func @transform_5(%arg0: i32) -> (i32, i32) {
    %c0_i32 = arith.constant 0 : i32
    %c0_i32_0 = arith.constant 0 : i32
    %c0_i32_1 = arith.constant 0 : i32
    return %c0_i32, %c0_i32_0 : i32, i32
  }
  func.func @transform_6(%arg0: i32) -> (i32, i32) {
    %c0_i32 = arith.constant 0 : i32
    %c0_i32_0 = arith.constant 0 : i32
    %c0_i32_1 = arith.constant 0 : i32
    return %c0_i32, %c0_i32_0 : i32, i32
  }
  func.func @transform_7(%arg0: i32) -> (i32, i32) {
    %c0_i32 = arith.constant 0 : i32
    %c0_i32_0 = arith.constant 0 : i32
    return %arg0, %c0_i32 : i32, i32
  }
}

</mosaic_0001>

<bundles_post_ra>
// kernel: neural_net_forward.1
= control target key start
LH: loop header
LB: loop body
LE: loop exit
PB: predicated region body
PF: predicated region fallthrough
CT: control target
= control target key end

     0   :  { %v500_v1 = vmov 0.0   ;;  %vm501_vm0 = vmmov 0   ;;  %vm68_vm1 = vcmask 523264   ;;  %s653_s0 = inlined_call_operand.vmem [shape: bf16[8,64], index: 0, kind: input, shape index: {}]   ;;  %s654_s1 = inlined_call_operand.vmem [shape: bf16[64,128], index: 1, kind: input, shape index: {}]   ;;  %s655_s2 = inlined_call_operand.vmem [shape: f32[1,128], index: 2, kind: input, shape index: {}]   ;;  %s656_s3 = inlined_call_operand.vmem [shape: bf16[128,128], index: 3, kind: input, shape index: {}]   ;;  %s657_s4 = inlined_call_operand.vmem [shape: f32[1,128], index: 4, kind: input, shape index: {}]   ;;  %s658_s5 = inlined_call_operand.vmem [shape: bf16[128,32], index: 5, kind: input, shape index: {}]   ;;  %s659_s6 = inlined_call_operand.vmem [shape: f32[1,32], index: 6, kind: input, shape index: {}]   ;;  %s660_s7 = inlined_call_operand.hbm [shape: f32[8,32], index: 7, kind: output, shape index: {}]  }
   0x1   :  { %v456_v0 = vld [vmem:[%s654_s1] sm:$0xff]   ;;  %401 = vmatprep.subr.bf16.mxu0 %v500_v1  ;;  %413 = vmatprep.subr.bf16.mxu1 %v500_v1  ;;  %v457_v2 = vld [vmem:[%s654_s1 + $0x8] sm:$0xff]   ;;  %v458_v4 = vld [vmem:[%s654_s1 + $0x10] sm:$0xff]  }
   0x2   :  { %402 = vmatpush3.bf16.msra.mxu0 %v456_v0  ;;  %409 = vmatprep.mubr.msk.bf16.mxu0 %vm501_vm0, %v500_v1  ;;  %v460_v3 = vld [vmem:[%s656_s3] sm:$0xff]   ;;  %v461_v5 = vld [vmem:[%s656_s3 + $0x8] sm:$0xff]   ;;  %v459_v6 = vld [vmem:[%s654_s1 + $0x18] sm:$0xff]  }
   0x3   :  { %403 = vmatprep.subr.bf16.mxu0 %v500_v1  ;;  %429 = vmatprep.mubr.msk.bf16.mxu1 %vm501_vm0, %v500_v1  ;;  %v462_v7 = vld [vmem:[%s656_s3 + $0x10] sm:$0xff]   ;;  %v28_v8 = vld [vmem:[%s653_s0] sm:$0xf]  ;;  %v463_v9 = vld [vmem:[%s656_s3 + $0x18] sm:$0xff]  }
   0x4   :  { %414 = vmatpush3.bf16.msra.mxu1 %v460_v3 }
   0x5   :  { %415 = vmatprep.subr.bf16.mxu1 %v500_v1 }
   0x6   :  { %404 = vmatpush3.bf16.msra.mxu0 %v457_v2 }
   0x7   :  { %405 = vmatprep.subr.bf16.mxu0 %v500_v1 }
   0x8   :  { %416 = vmatpush3.bf16.msra.mxu1 %v461_v5 }
   0x9   :  { %417 = vmatprep.subr.bf16.mxu1 %v500_v1 }
   0xa   :  { %406 = vmatpush3.bf16.msra.mxu0 %v458_v4 }
   0xb   :  { %407 = vmatprep.subr.bf16.mxu0 %v500_v1 }
   0xc   :  { %418 = vmatpush3.bf16.msra.mxu1 %v462_v7 }
   0xd   :  { %419 = vmatprep.subr.bf16.mxu1 %v500_v1 }
   0xe   :  { %408 = vmatpush3.bf16.msra.mxu0 %v459_v6 }
   0xf   :  { %433 = vmatprep.subr.bf16.mxu0 %v500_v1 }
  0x11   :  { %410 = vmatmul.mubr.msk.bf16.vlgmr.msra.gmra.mrb[0].mxu0 %vm68_vm1, %v28_v8 }
  0x12   :  { %12 = vsyncpa [#allocation3], 0  ;;  %449 = vmatprep.mubr.msk.bf16.mxu0 %vm501_vm0, %v500_v1  ;;  %420 = vmatpush3.bf16.msra.mxu1 %v463_v9  ;;  %v464_v10 = vld [vmem:[%s656_s3 + $0x20] sm:$0xff]   ;;  %v465_v11 = vld [vmem:[%s656_s3 + $0x28] sm:$0xff]   ;;  %s502_s20 = smov [#allocation2]   ;;  %vm338_vm2 = vcmask 261120  }
  0x13   :  { %421 = vmatprep.subr.bf16.mxu1 %v500_v1  ;;  %v466_v12 = vld [vmem:[%s656_s3 + $0x30] sm:$0xff]   ;;  %v467_v13 = vld [vmem:[%s656_s3 + $0x38] sm:$0xff]   ;;  %v468_v14 = vld [vmem:[%s658_s5] sm:$0xff]   ;;  %s346_s21 = sshll.u32 %s502_s20, 4  ;;  %s347_s21 = int_to_ptr.vmem [resolvable:$true] %s346_s21 }
  0x14   :  { %434 = vmatpush3.bf16.msra.mxu0 %v468_v14  ;;  %v469_v15 = vld [vmem:[%s658_s5 + $0x8] sm:$0xff]   ;;  %v470_v16 = vld [vmem:[%s658_s5 + $0x10] sm:$0xff]   ;;  %v471_v17 = vld [vmem:[%s658_s5 + $0x18] sm:$0xff]   ;;  %p481_p1 = scmp.lt.s32.totalorder %s347_s21, %s347_s21 }
  0x15   :  { %435 = vmatprep.subr.bf16.mxu0 %v500_v1  ;;  %v472_v18 = vld [vmem:[%s658_s5 + $0x20] sm:$0xff]   ;;  %v473_v19 = vld [vmem:[%s658_s5 + $0x28] sm:$0xff]   ;;  %v474_v28 = vld [vmem:[%s658_s5 + $0x30] sm:$0xff]  }
  0x16   :  { %422 = vmatpush3.bf16.msra.mxu1 %v464_v10  ;;  %v354_v20 = vld [vmem:[%s655_s2] ss:$0 sm:$0xff]  ;;  %v475_v29 = vld [vmem:[%s658_s5 + $0x38] sm:$0xff]  }
  0x17   :  { %423 = vmatprep.subr.bf16.mxu1 %v500_v1  ;;  %v360_v30 = vld [vmem:[%s657_s4] ss:$0 sm:$0xff]  ;;  %s476_s4 = scalar_lea.vmem %s347_s21, 128 }
  0x18   :  { %436 = vmatpush3.bf16.msra.mxu0 %v469_v15  ;;  %v369_v38 = vld [vmem:[%s659_s6] ss:$0 sm:$0xff]  ;;  %p477_p0 = scmp.ne.s32.totalorder %s347_s21, %s476_s4  ;;  %p482_p2 = scmp.lt.s32.totalorder %s476_s4, %s476_s4 }
  0x19   :  { %437 = vmatprep.subr.bf16.mxu0 %v500_v1 }
  0x1a   :  { %424 = vmatpush3.bf16.msra.mxu1 %v465_v11  ;;  %p483_p3 = por %p482_p2, %p481_p1 }
  0x1b   :  { %425 = vmatprep.subr.bf16.mxu1 %v500_v1 }
  0x1c   :  { %438 = vmatpush3.bf16.msra.mxu0 %v470_v16  ;;  %p484_p4 = pnand %p483_p3, %p477_p0 }
  0x1d   :  { %439 = vmatprep.subr.bf16.mxu0 %v500_v1 }
  0x1e   :  { %426 = vmatpush3.bf16.msra.mxu1 %v466_v12 }
  0x1f   :  { %427 = vmatprep.subr.bf16.mxu1 %v500_v1 }
  0x20   :  { %440 = vmatpush3.bf16.msra.mxu0 %v471_v17 }
  0x21   :  { %441 = vmatprep.subr.bf16.mxu0 %v500_v1 }
  0x22   :  { %428 = vmatpush3.bf16.msra.mxu1 %v467_v13 }
  0x24   :  { %442 = vmatpush3.bf16.msra.mxu0 %v472_v18 }
  0x25   :  { %443 = vmatprep.subr.bf16.mxu0 %v500_v1 }
  0x28   :  { %444 = vmatpush3.bf16.msra.mxu0 %v473_v19 }
  0x29   :  { %445 = vmatprep.subr.bf16.mxu0 %v500_v1 }
  0x2c   :  { %446 = vmatpush3.bf16.msra.mxu0 %v474_v28 }
  0x2d   :  { %447 = vmatprep.subr.bf16.mxu0 %v500_v1 }
  0x30   :  { %448 = vmatpush3.bf16.msra.mxu0 %v475_v29 }
  0xe4   :  { %v106_v21 = vpop.f32.mrb[0].mxu0 }
  0xe5   :  { %v107_v22 = vadd.f32 %v354_v20, %v106_v21  ;;  %v411_v23 = vpop.f32.mrb[1].mxu0 }
  0xe6   :  { %v109_v24 = vpop.f32.mrb[2].mxu0 }
  0xe7   :  { %v112_v25 = vmax.f32 %v107_v22, 0.0  ;;  %v412_v26 = vpop.f32.mrb[3].mxu0 }
  0xe9   :  { %v113_v27 = vpack.c.bf16 %v112_v25, %v112_v25 }
  0xeb   :  { %430 = vmatmul.mubr.bf16.vlgmr.msra.gmra.mrb[0].mxu1 %v113_v27 }
 0x1be   :  { %v219_v31 = vpop.f32.mrb[0].mxu1 }
 0x1bf   :  { %v220_v32 = vadd.f32 %v360_v30, %v219_v31  ;;  %v431_v33 = vpop.f32.mrb[1].mxu1 }
 0x1c0   :  { %v222_v34 = vpop.f32.mrb[2].mxu1 }
 0x1c1   :  { %v225_v35 = vmax.f32 %v220_v32, 0.0  ;;  %v432_v36 = vpop.f32.mrb[3].mxu1 }
 0x1c3   :  { %v226_v37 = vpack.c.bf16 %v225_v35, %v225_v35 }
 0x1c5   :  { %450 = vmatmul.mubr.bf16.vlgmr.msra.gmra.mrb[4].mxu0 %v226_v37 }
 0x298   :  { %v332_v39 = vpop.f32.mrb[4].mxu0 }
 0x299   :  { %v333_v40 = vadd.f32 %v369_v38, %v332_v39  ;;  %v451_v41 = vpop.f32.mrb[5].mxu0 }
 0x29a   :  { %v335_v42 = vpop.f32.mrb[6].mxu0 }
 0x29b   :  { %v452_v43 = vpop.f32.mrb[7].mxu0  ;;  %339 = vst.msk [vmem:[#allocation2] sm:$0xff] %vm338_vm2, %v333_v40 }
 0x29c   :  { %487 = shalt.err (!%p484_p4)
}
 0x29d   :  { %s488_s6 = scalar_lea.hbm %s660_s7, 128 }
 0x29e   :  { %p489_p5 = scmp.ne.s32.totalorder %s660_s7, %s488_s6  ;;  %p492_p6 = scmp.lt.u32.totalorder %s488_s6, %s660_s7 }
 0x2a0   :  { %p494_p7 = pnand %p492_p6, %p489_p5 }
 0x2a2   :  { %497 = shalt.err (!%p494_p7)
}
 0x2a3   :  { %349 = dma.vmem_to_hbm [thread:$0]  %s347_s21, 128, %s660_s7, [#allocation3]  }
 0x2a4   :  { %498 = dma.done.wait [#allocation3], 128  }
 0x2a5   :  { %499 = vsyncadd [#allocation3], 4294967168 }
 0x2a6   :  { %353 = vsyncpa [#allocation3], 1 }

</bundles_post_ra>
